<compile_context>
chip_gen: v6e
topology: v6e:2x2x1
jax: 0.10.0
libtpu: 0.0.40
codegen_flags: <defaults>
</compile_context>

<pallas_src>
import functools

import jax
import jax.numpy as jnp
from jax.experimental import pallas as pl
from jax.experimental.pallas import tpu as pltpu


def _round_up(x, m):
    return ((x + m - 1) // m) * m


def _vmem_capacity_bytes():
    try:
        return int(pltpu.get_tpu_info().vmem_capacity_bytes)
    except Exception:
        return 64 * 1024 * 1024  # conservative fallback (v7x per-TC VMEM)


def _default_compute_dtype():
    """bf16 on chips with a bf16 VPU/MXU datapath (v6e/v7x), f32 otherwise."""
    try:
        kind = jax.devices()[0].device_kind.lower()
    except Exception:
        return jnp.float32
    for tag in ("v2", "v3", "v4", "v5 lite", "v5lite", "v5e"):
        if tag in kind:
            return jnp.float32
    return jnp.bfloat16


# --------------------------------------------------------------------------
# Kernel
# --------------------------------------------------------------------------
def _actor_kernel(state_ref, w1_ref, b1_ref, w2_ref, b2_ref, w34_ref, b34_ref,
                  out_ref):
    # Cast the activation tile in-kernel (no-op for f32; avoids a separate XLA
    # pass over `state` when the weights are shipped in bf16).
    x = state_ref[...].astype(w1_ref.dtype)
    # fc1 + relu  (MXU matmul, f32 accumulate; bias add + relu in f32 on VPU)
    h = jnp.dot(x, w1_ref[...], preferred_element_type=jnp.float32) + b1_ref[...]
    h = jnp.maximum(h, 0.0).astype(w2_ref.dtype)
    # fc2 + relu
    h = jnp.dot(h, w2_ref[...], preferred_element_type=jnp.float32) + b2_ref[...]
    h = jnp.maximum(h, 0.0).astype(w34_ref.dtype)
    # folded fc_latent @ fc_action (single matmul, exact fold)
    logits = jnp.dot(h, w34_ref[...], preferred_element_type=jnp.float32) + b34_ref[...]
    out_ref[...] = logits.astype(out_ref.dtype)


# --------------------------------------------------------------------------
# One-time parameter preparation (hoisted out of the per-step forward)
# --------------------------------------------------------------------------
def prepare_actor_params(raw, *, compute_dtype=None):
    """Fold fc_latent->fc_action, pad feature dims to 128, cast weights.

    `raw` holds transposed weights (in_features, out_features) and (1, out)
    biases, as produced by `init_params`. Returns the kernel-ready dict.
    """
    if compute_dtype is None:
        compute_dtype = _default_compute_dtype()
    cd = jnp.dtype(compute_dtype)

    w1, b1 = raw["w1"], raw["b1"]
    w2, b2 = raw["w2"], raw["b2"]
    # Exact fold: no nonlinearity between fc_latent and fc_action.
    w34 = raw["w3"] @ raw["w4"]                     # (hidden, action)
    b34 = raw["b3"] @ raw["w4"] + raw["b4"]         # (1, action)

    hidden = w1.shape[1]
    action = w34.shape[1]
    h_pad = _round_up(hidden, 128)
    a_pad = _round_up(action, 128)

    def pad_cols(a, cols):
        return jnp.pad(a, ((0, 0), (0, cols - a.shape[1])))

    def pad_rows(a, rows):
        return jnp.pad(a, ((0, rows - a.shape[0]), (0, 0)))

    # Zero-padding is exact: padded hidden columns are relu(0 + 0) = 0 and the
    # corresponding padded weight rows contribute nothing downstream.
    w1 = pad_cols(w1, h_pad)
    b1 = pad_cols(b1, h_pad)
    w2 = pad_cols(pad_rows(w2, h_pad), h_pad)
    b2 = pad_cols(b2, h_pad)
    w34 = pad_cols(pad_rows(w34, h_pad), a_pad)
    b34 = pad_cols(b34, a_pad)

    return dict(
        w1=w1.astype(cd), b1=b1.astype(jnp.float32),
        w2=w2.astype(cd), b2=b2.astype(jnp.float32),
        w34=w34.astype(cd), b34=b34.astype(jnp.float32),
    )


# --------------------------------------------------------------------------
# Forward
# --------------------------------------------------------------------------
@functools.partial(jax.jit, static_argnames=("action_dim", "block_b", "out_dtype"))
def dreamer_v3_actor_forward(state, params, *, action_dim, block_b=None,
                             out_dtype=None):
    """state: (B, state_dim) f32. params: output of `prepare_actor_params`."""
    B, state_dim = state.shape
    h_pad = params["w1"].shape[1]
    a_pad = params["w34"].shape[1]
    compute_dtype = params["w1"].dtype

    if out_dtype is None:
        # bf16 writeback halves the lane-padded logits store stream; the tiny
        # sliced result is cast back to f32 after the call.
        out_dtype = jnp.bfloat16 if compute_dtype == jnp.bfloat16 else jnp.float32
    out_dtype = jnp.dtype(out_dtype)

    # ---- batch tile selection ------------------------------------------
    sub = 16 if compute_dtype == jnp.bfloat16 else 8   # bf16 packs 16 sublanes/vreg
    if block_b is None:
        block_b = 512                                   # mem-bound: big tiles win
    tb = _round_up(min(block_b, _round_up(B, sub)), sub)
    # Keep >= 2 batch tiles whenever possible so a v7x megacore can shard the
    # "parallel" grid axis across both TensorCores (no effect on v5e/v6e).
    if B > sub and pl.cdiv(B, tb) < 2:
        tb = _round_up(pl.cdiv(B, 2), sub)

    # ---- VMEM budget: 1x resident weights + 2x pipelined (state, out) tiles
    weight_bytes = sum(
        int(v.size) * v.dtype.itemsize
        for v in (params["w1"], params["b1"], params["w2"], params["b2"],
                  params["w34"], params["b34"]))
    cap = _vmem_capacity_bytes()
    per_row = (2 * (state_dim * state.dtype.itemsize + a_pad * out_dtype.itemsize)
               + 2 * h_pad * 4)                          # + intermediate-h slack
    avail = int(cap * 0.7) - weight_bytes
    if avail > 0:
        max_rows = max(sub, (avail // per_row) // sub * sub)
        tb = min(tb, max_rows)
    grid = (pl.cdiv(B, tb),)

    vmem_limit = int(min(cap, max(weight_bytes + tb * per_row + (4 << 20),
                                  16 << 20)))

    # ---- specs ----------------------------------------------------------
    def resident(arr):
        # Constant block index -> stays in VMEM across grid steps; single
        # buffering halves the weight footprint vs the default 2-deep pipeline.
        return pl.BlockSpec(arr.shape, lambda i: (0, 0),
                            pipeline_mode=pl.Buffered(1))

    in_specs = [
        pl.BlockSpec((tb, state_dim), lambda i: (i, 0)),   # state tile (pipelined)
        resident(params["w1"]), resident(params["b1"]),
        resident(params["w2"]), resident(params["b2"]),
        resident(params["w34"]), resident(params["b34"]),
    ]
    out_spec = pl.BlockSpec((tb, a_pad), lambda i: (i, 0))

    out = pl.pallas_call(
        _actor_kernel,
        out_shape=jax.ShapeDtypeStruct((B, a_pad), out_dtype),
        grid=grid,
        in_specs=in_specs,
        out_specs=out_spec,
        compiler_params=pltpu.CompilerParams(
            dimension_semantics=("parallel",),
            vmem_limit_bytes=vmem_limit,
        ),
    )(state, params["w1"], params["b1"], params["w2"], params["b2"],
      params["w34"], params["b34"])

    return out[:, :action_dim].astype(jnp.float32)


# --------------------------------------------------------------------------
# Init + reference (PyTorch-equivalent)
# --------------------------------------------------------------------------
def init_params(key, state_dim, hidden_dim, latent_dim, action_dim):
    """PyTorch-style uniform(+-1/sqrt(fan_in)) init; weights stored transposed."""
    def linear(key, fan_in, fan_out):
        kw, kb = jax.random.split(key)
        bound = 1.0 / jnp.sqrt(fan_in)
        w = jax.random.uniform(kw, (fan_in, fan_out), jnp.float32, -bound, bound)
        b = jax.random.uniform(kb, (1, fan_out), jnp.float32, -bound, bound)
        return w, b

    k1, k2, k3, k4 = jax.random.split(key, 4)
    w1, b1 = linear(k1, state_dim, hidden_dim)
    w2, b2 = linear(k2, hidden_dim, hidden_dim)
    w3, b3 = linear(k3, hidden_dim, latent_dim)
    w4, b4 = linear(k4, latent_dim, action_dim)
    return dict(w1=w1, b1=b1, w2=w2, b2=b2, w3=w3, b3=b3, w4=w4, b4=b4)


def reference_forward(state, p):
    """Unfolded reference matching the PyTorch module exactly."""
    x = jax.nn.relu(state @ p["w1"] + p["b1"])
    x = jax.nn.relu(x @ p["w2"] + p["b2"])
    latent = x @ p["w3"] + p["b3"]
    return latent @ p["w4"] + p["b4"]


if __name__ == "__main__":
    # B=100 exercises the ragged last batch tile and the >=2-tile grid split;
    # hidden=64 / action=16 exercise the feature/lane padding paths.
    B, state_dim, hidden_dim, latent_dim, action_dim = 100, 32, 64, 32, 16

    key = jax.random.PRNGKey(0)
    k_state, k_params = jax.random.split(key)
    state = jax.random.normal(k_state, (B, state_dim), jnp.float32)
    raw = init_params(k_params, state_dim, hidden_dim, latent_dim, action_dim)

    ref = reference_forward(state, raw)

    # f32 path: tight tolerance vs the unfolded PyTorch-equivalent reference.
    p32 = prepare_actor_params(raw, compute_dtype=jnp.float32)
    logits32 = jax.block_until_ready(
        dreamer_v3_actor_forward(state, p32, action_dim=action_dim))
    assert logits32.shape == (B, action_dim)
    assert jnp.allclose(logits32, ref, atol=1e-4, rtol=1e-4), "f32 mismatch vs reference"

    # Device-default path (bf16 weights/activations on v6e/v7x, f32 elsewhere).
    auto_dtype = _default_compute_dtype()
    p_auto = prepare_actor_params(raw, compute_dtype=auto_dtype)
    logits_auto = jax.block_until_ready(
        dreamer_v3_actor_forward(state, p_auto, action_dim=action_dim))
    assert logits_auto.shape == (B, action_dim)
    tol = 1e-4 if jnp.dtype(auto_dtype) == jnp.dtype(jnp.float32) else 1e-1
    assert jnp.allclose(logits_auto, ref, atol=tol, rtol=tol), "auto-dtype mismatch vs reference"

    print("KERNEL_OK")
</pallas_src>

<mosaic_0001>
module attributes {stable_mosaic.version = 11 : i64} {
  func.func @_actor_kernel(%arg0: i32, %arg1: memref<56x32xf32, #tpu.memory_space<vmem>>, %arg2: memref<32x128xf32, #tpu.memory_space<vmem>>, %arg3: memref<1x128xf32, #tpu.memory_space<vmem>>, %arg4: memref<128x128xf32, #tpu.memory_space<vmem>>, %arg5: memref<1x128xf32, #tpu.memory_space<vmem>>, %arg6: memref<128x128xf32, #tpu.memory_space<vmem>>, %arg7: memref<1x128xf32, #tpu.memory_space<vmem>>, %arg8: memref<56x128xf32, #tpu.memory_space<vmem>>) attributes {dimension_semantics = [#tpu.dimension_semantics<parallel>], iteration_bounds = array<i64: 2>, scalar_prefetch = 0 : i64, scratch_operands = 0 : i64, tpu.core_type = #tpu.core_type<tc>, window_params = [{transform_indices = @transform_0, window_bounds = array<i64: 56, 32>}, {pipeline_mode = #tpu.pipeline_mode<synchronous>, transform_indices = @transform_1, window_bounds = array<i64: 32, 128>}, {pipeline_mode = #tpu.pipeline_mode<synchronous>, transform_indices = @transform_2, window_bounds = array<i64: 1, 128>}, {pipeline_mode = #tpu.pipeline_mode<synchronous>, transform_indices = @transform_3, window_bounds = array<i64: 128, 128>}, {pipeline_mode = #tpu.pipeline_mode<synchronous>, transform_indices = @transform_4, window_bounds = array<i64: 1, 128>}, {pipeline_mode = #tpu.pipeline_mode<synchronous>, transform_indices = @transform_5, window_bounds = array<i64: 128, 128>}, {pipeline_mode = #tpu.pipeline_mode<synchronous>, transform_indices = @transform_6, window_bounds = array<i64: 1, 128>}, {transform_indices = @transform_7, window_bounds = array<i64: 56, 128>}]} {
    %c0 = arith.constant 0 : index
    %c0_0 = arith.constant 0 : index
    %0 = vector.load %arg1[%c0, %c0_0] : memref<56x32xf32, #tpu.memory_space<vmem>>, vector<56x32xf32>
    %c0_1 = arith.constant 0 : index
    %c0_2 = arith.constant 0 : index
    %1 = vector.load %arg2[%c0_1, %c0_2] : memref<32x128xf32, #tpu.memory_space<vmem>>, vector<32x128xf32>
    %cst = arith.constant dense<0.000000e+00> : vector<56x128xf32>
    %2 = tpu.matmul %0, %1, %cst {dimension_numbers = #tpu.dot_dimension_numbers<[1], [0], [0], [1], [0, 0, 1, 1], [], []>} : vector<56x32xf32>, vector<32x128xf32>, vector<56x128xf32> -> vector<56x128xf32>
    %c0_3 = arith.constant 0 : index
    %c0_4 = arith.constant 0 : index
    %3 = vector.load %arg3[%c0_3, %c0_4] : memref<1x128xf32, #tpu.memory_space<vmem>>, vector<1x128xf32>
    %4 = vector.broadcast %3 : vector<1x128xf32> to vector<56x128xf32>
    %5 = arith.addf %2, %4 : vector<56x128xf32>
    %cst_5 = arith.constant 0.000000e+00 : f32
    %6 = vector.broadcast %cst_5 : f32 to vector<56x128xf32>
    %7 = arith.maximumf %5, %6 : vector<56x128xf32>
    %c0_6 = arith.constant 0 : index
    %c0_7 = arith.constant 0 : index
    %8 = vector.load %arg4[%c0_6, %c0_7] : memref<128x128xf32, #tpu.memory_space<vmem>>, vector<128x128xf32>
    %cst_8 = arith.constant dense<0.000000e+00> : vector<56x128xf32>
    %9 = tpu.matmul %7, %8, %cst_8 {dimension_numbers = #tpu.dot_dimension_numbers<[1], [0], [0], [1], [0, 0, 1, 1], [], []>} : vector<56x128xf32>, vector<128x128xf32>, vector<56x128xf32> -> vector<56x128xf32>
    %c0_9 = arith.constant 0 : index
    %c0_10 = arith.constant 0 : index
    %10 = vector.load %arg5[%c0_9, %c0_10] : memref<1x128xf32, #tpu.memory_space<vmem>>, vector<1x128xf32>
    %11 = vector.broadcast %10 : vector<1x128xf32> to vector<56x128xf32>
    %12 = arith.addf %9, %11 : vector<56x128xf32>
    %cst_11 = arith.constant 0.000000e+00 : f32
    %13 = vector.broadcast %cst_11 : f32 to vector<56x128xf32>
    %14 = arith.maximumf %12, %13 : vector<56x128xf32>
    %c0_12 = arith.constant 0 : index
    %c0_13 = arith.constant 0 : index
    %15 = vector.load %arg6[%c0_12, %c0_13] : memref<128x128xf32, #tpu.memory_space<vmem>>, vector<128x128xf32>
    %cst_14 = arith.constant dense<0.000000e+00> : vector<56x128xf32>
    %16 = tpu.matmul %14, %15, %cst_14 {dimension_numbers = #tpu.dot_dimension_numbers<[1], [0], [0], [1], [0, 0, 1, 1], [], []>} : vector<56x128xf32>, vector<128x128xf32>, vector<56x128xf32> -> vector<56x128xf32>
    %c0_15 = arith.constant 0 : index
    %c0_16 = arith.constant 0 : index
    %17 = vector.load %arg7[%c0_15, %c0_16] : memref<1x128xf32, #tpu.memory_space<vmem>>, vector<1x128xf32>
    %18 = vector.broadcast %17 : vector<1x128xf32> to vector<56x128xf32>
    %19 = arith.addf %16, %18 : vector<56x128xf32>
    %c0_17 = arith.constant 0 : index
    %c0_18 = arith.constant 0 : index
    %20 = vector.load %arg8[%c0_17, %c0_18] : memref<56x128xf32, #tpu.memory_space<vmem>>, vector<56x128xf32>
    tpu.vector_store %arg8[%c0_17, %c0_18], %19 {strides = array<i32>} : memref<56x128xf32, #tpu.memory_space<vmem>>, vector<56x128xf32>,
    return
  }
  func.func @transform_0(%arg0: i32) -> (i32, i32) {
    %c0_i32 = arith.constant 0 : i32
    %c0_i32_0 = arith.constant 0 : i32
    return %arg0, %c0_i32 : i32, i32
  }
  func.func @transform_1(%arg0: i32) -> (i32, i32) {
    %c0_i32 = arith.constant 0 : i32
    %c0_i32_0 = arith.constant 0 : i32
    %c0_i32_1 = arith.constant 0 : i32
    return %c0_i32, %c0_i32_0 : i32, i32
  }
  func.func @transform_2(%arg0: i32) -> (i32, i32) {
    %c0_i32 = arith.constant 0 : i32
    %c0_i32_0 = arith.constant 0 : i32
    %c0_i32_1 = arith.constant 0 : i32
    return %c0_i32, %c0_i32_0 : i32, i32
  }
  func.func @transform_3(%arg0: i32) -> (i32, i32) {
    %c0_i32 = arith.constant 0 : i32
    %c0_i32_0 = arith.constant 0 : i32
    %c0_i32_1 = arith.constant 0 : i32
    return %c0_i32, %c0_i32_0 : i32, i32
  }
  func.func @transform_4(%arg0: i32) -> (i32, i32) {
    %c0_i32 = arith.constant 0 : i32
    %c0_i32_0 = arith.constant 0 : i32
    %c0_i32_1 = arith.constant 0 : i32
    return %c0_i32, %c0_i32_0 : i32, i32
  }
  func.func @transform_5(%arg0: i32) -> (i32, i32) {
    %c0_i32 = arith.constant 0 : i32
    %c0_i32_0 = arith.constant 0 : i32
    %c0_i32_1 = arith.constant 0 : i32
    return %c0_i32, %c0_i32_0 : i32, i32
  }
  func.func @transform_6(%arg0: i32) -> (i32, i32) {
    %c0_i32 = arith.constant 0 : i32
    %c0_i32_0 = arith.constant 0 : i32
    %c0_i32_1 = arith.constant 0 : i32
    return %c0_i32, %c0_i32_0 : i32, i32
  }
  func.func @transform_7(%arg0: i32) -> (i32, i32) {
    %c0_i32 = arith.constant 0 : i32
    %c0_i32_0 = arith.constant 0 : i32
    return %arg0, %c0_i32 : i32, i32
  }
}

</mosaic_0001>

<bundles_post_ra>
// kernel: dreamer_v3_actor_forward.1
= control target key start
LH: loop header
LB: loop body
LE: loop exit
PB: predicated region body
PF: predicated region fallthrough
CT: control target
= control target key end

     0   :  { %12 = vsyncpa [#allocation3], 0  ;;  %s1833_s0 = inlined_call_operand.vmem [shape: f32[100,32], index: 0, kind: input, shape index: {}]   ;;  %s1834_s1 = inlined_call_operand.hbm [shape: f32[32,128], index: 1, kind: input, shape index: {}]   ;;  %s1835_s2 = inlined_call_operand.vmem [shape: f32[1,128], index: 2, kind: input, shape index: {}]   ;;  %s1836_s3 = inlined_call_operand.vmem [shape: f32[128,128], index: 3, kind: input, shape index: {}]   ;;  %s1837_s4 = inlined_call_operand.vmem [shape: f32[1,128], index: 4, kind: input, shape index: {}]   ;;  %s1838_s5 = inlined_call_operand.hbm [shape: f32[128,128], index: 5, kind: input, shape index: {}]   ;;  %s1839_s6 = inlined_call_operand.vmem [shape: f32[1,128], index: 6, kind: input, shape index: {}]   ;;  %s1840_s7 = inlined_call_operand.vmem [shape: f32[100,128], index: 7, kind: output, shape index: {}]  }
   0x1   :  { %13 = vsyncpa [#allocation5], 0  ;;  %s1538_s24 = smov 0   ;;  %s1540_s25 = smov 0  }
   0x2   :  { %s1542_s26 = smov 0  }
   0x3 LB: > { %s1551_s27 = sadd.s32 4294967295, %s1458_s26   ;;  %s1553_s28 = sadd.s32 1, %s1458_s26   ;;  %s1458_s26 = sphi %s1542_s26, %s1854_s26   ;;  %s1454_s25 = sphi %s1540_s25, %s1853_s25   ;;  %s1450_s24 = sphi %s1538_s24, %s1852_s24  }
   0x4   : > { %s175_s29 = ssub.s32 %s1458_s26, %s1553_s28  ;;  %s178_s30 = sadd.s32 1, %s1454_s25 }
   0x5   : > { %p176_p0 = scmp.eq.s32.totalorder %s175_s29, 0  ;;  %p188_p1 = scmp.ne.s32.totalorder %s1454_s25, %s1450_s24 }
   0x6   : > { %p189_p2 = scmp.eq.s32.totalorder %s1551_s27, 1  ;;  %p1002_p3 = scmp.ge.s32.totalorder %s1458_s26, 1 }
   0x7   : > { %s1561_s8 = scalar_select %p176_p0, %s1454_s25, %s178_s30  }
   0x8   : > { %p1563_p4 = por %p189_p2, %p188_p1  ;;  %p202_p5 = scmp.lt.s32.totalorder %s1458_s26, 3 }
   0x9   : > { %p1841_p6 = scmp.eq.s32.totalorder %s1551_s27, 0  ;;  %s1492_s11 = smov [#allocation2]  }
   0xa   : > { %p1568_p7 = pnand %p1002_p3, %p202_p5  ;;  %s214_s12 = sshll.u32 %s1492_s11, 4  ;;  %s215_s12 = int_to_ptr.vmem [resolvable:$true] %s214_s12 }
   0xb   : > { %s1493_s14 = smov [#allocation4]   ;;  %s1355_s16 = scalar_lea.vmem %s215_s12, 512 }
   0xc   : > { %p1234_p8 = pneg %p1568_p7  ;;  %s236_s15 = sshll.u32 %s1493_s14, 4  ;;  %s237_s15 = int_to_ptr.vmem [resolvable:$true] %s236_s15 }
   0xd   : > { %p1356_p11 = scmp.ne.s32.totalorder %s215_s12, %s1355_s16  ;;  %p1363_p0 = scmp.lt.s32.totalorder %s215_s12, %s215_s12 }
   0xe   : > { %p1576_p9 = pnand %p1841_p6, %p1234_p8  ;;  %p1364_p1 = scmp.lt.s32.totalorder %s1355_s16, %s1355_s16 }
  0x10   : > { %p1346_p10 = pneg %p1576_p9  ;;  %p1365_p2 = por %p1364_p1, %p1363_p0 }
  0x12   : > { %p1358_p12 = pnand %p1356_p11, %p1346_p10 }
  0x14   : > { %p1359_p13 = pneg %p1358_p12 }
  0x16   : > { %p1366_p3 = pnand %p1365_p2, %p1359_p13 }
  0x18   : > { %1369 = shalt.err (!%p1366_p3)
}
  0x19   : > { %s1494_s17 = smov 128   ;;  %s1495_s18 = smov 8  }
  0x1a   : > { %1237 = dma.hbm_to_vmem [thread:$0]  (!%p1576_p9), %s1834_s1, 512, %s215_s12, [#allocation3], %s1494_s17, %s1494_s17, %s1495_s18  }
  0x1b   : > { %s1381_s21 = scalar_lea.vmem %s237_s15, 2048  ;;  %p1389_p12 = scmp.lt.s32.totalorder %s237_s15, %s237_s15 }
  0x1c   : > { %p1382_p5 = scmp.ne.s32.totalorder %s237_s15, %s1381_s21  ;;  %p1390_p6 = scmp.lt.s32.totalorder %s1381_s21, %s1381_s21 }
  0x1e   : > { %p1384_p8 = pnand %p1382_p5, %p1346_p10  ;;  %p1391_p0 = por %p1390_p6, %p1389_p12 }
  0x20   : > { %p1385_p11 = pneg %p1384_p8 }
  0x22   : > { %p1392_p13 = pnand %p1391_p0, %p1385_p11 }
  0x24   : > { %1395 = shalt.err (!%p1392_p13)
}
  0x25   : > { %1240 = dma.hbm_to_vmem [thread:$0]  (!%p1576_p9), %s1838_s5, 2048, %s237_s15, [#allocation5], %s1494_s17, %s1494_s17, %s1495_s18  }
  0x26   : > { %272 = sbr.rel (%p1568_p7) target bundleno = 724 (0x2d4), region = 48  ;;  %p1845_p1 = scmp.eq.s32.totalorder (!%p1568_p7), %s1551_s27, 0 }
  0x2b   : > { %1441 = dma.done.wait (%p1845_p1), [#allocation3], 512   ;;  %p1846_p10 = pmov %p1845_p1 }
  0x2c   : > { %p1847_p2 = pmov %p1845_p1 }
  0x2d   : > { %1443 = vsyncadd (%p1846_p10), [#allocation3], 4294966784 }
  0x2e   : > { %1445 = dma.done.wait (%p1847_p2), [#allocation5], 2048   ;;  %p1848_p6 = pmov %p1845_p1 }
  0x2f   : > { %s1609_s26 = smul.u32 7, %s1551_s27  ;;  %v1496_v0 = vmov 0.0   ;;  %vm1497_vm0 = vmmov 0   ;;  %v340_v1 = vld [vmem:[#allocation2 + $0x18] sm:$0xff]  ;;  %v339_v2 = vld [vmem:[#allocation2 + $0x10] sm:$0xff]  ;;  %v338_v3 = vld [vmem:[#allocation2 + $0x8] sm:$0xff] }
  0x30   : > { %1447 = vsyncadd (%p1848_p6), [#allocation5], 4294965248  ;;  %1090 = vmatprep.subr.mxu0 %v1496_v0  ;;  %1098 = vmatprep.mubr.msk.f32.mxu0 %vm1497_vm0, %v1496_v0  ;;  %v492_v4 = vld [vmem:[%s1836_s3 + $0x78] sm:$0xff]  ;;  %v337_v5 = vld [vmem:[#allocation2] sm:$0xff]  ;;  %vm348_vm1 = vcmask 261120   ;;  %s308_s18 = sand.u32 1, %s1450_s24  }
  0x31   : > { %p316_p7 = scmp.lt.s32.totalorder %s1609_s26, 12  ;;  %1119 = vmatprep.subr.mxu1 %v1496_v0  ;;  %1151 = vmatprep.mubr.msk.f32.mxu1 %vm1497_vm0, %v1496_v0  ;;  %v491_v6 = vld [vmem:[%s1836_s3 + $0x70] sm:$0xff]  ;;  %v490_v8 = vld [vmem:[%s1836_s3 + $0x68] sm:$0xff]  ;;  %v489_v9 = vld [vmem:[%s1836_s3 + $0x60] sm:$0xff]  ;;  %s1225_s19 = smul.u32 56, %s308_s18 }
  0x32   : > { %1091 = vmatpush3.msra.mxu0 %v340_v1  ;;  %1120 = vmatpush3.msra.mxu1 %v492_v4  ;;  %v488_v11 = vld [vmem:[%s1836_s3 + $0x58] sm:$0xff]  ;;  %v487_v12 = vld [vmem:[%s1836_s3 + $0x50] sm:$0xff]  ;;  %v486_v14 = vld [vmem:[%s1836_s3 + $0x48] sm:$0xff]  ;;  %s745_s24 = ssub.s32 (%p1563_p4), 13, %s1609_s26  ;;  %s1032_s23 = smul.u32 (%p1563_p4), 56, %s1551_s27 }
  0x33   : > { %s317_s29 = scalar_select %p316_p7, %s1609_s26, 12  ;;  %1092 = vmatprep.subr.mxu0 %v1496_v0  ;;  %1121 = vmatprep.subr.mxu1 %v1496_v0  ;;  %v485_v15 = vld [vmem:[%s1836_s3 + $0x40] sm:$0xff]  ;;  %v484_v17 = vld [vmem:[%s1836_s3 + $0x38] sm:$0xff]  ;;  %v483_v18 = vld [vmem:[%s1836_s3 + $0x30] sm:$0xff] }
  0x34   : > { %1093 = vmatpush3.msra.mxu0 %v339_v2  ;;  %1122 = vmatpush3.msra.mxu1 %v491_v6  ;;  %v482_v20 = vld [vmem:[%s1836_s3 + $0x28] sm:$0xff]  ;;  %v481_v21 = vld [vmem:[%s1836_s3 + $0x20] sm:$0xff]  ;;  %v480_v23 = vld [vmem:[%s1836_s3 + $0x18] sm:$0xff]  ;;  %s1768_s22 = scalar_lea.vmem [#allocation6], %s1225_s19   ;;  %p746_p9 = scmp.lt.s32.totalorder (%p1563_p4), %s745_s24, 7 }
  0x35   : > { %s1009_s30 = sshll.u32 %s317_s29, 3  ;;  %1094 = vmatprep.subr.mxu0 %v1496_v0  ;;  %1123 = vmatprep.subr.mxu1 %v1496_v0  ;;  %v479_v25 = vld [vmem:[%s1836_s3 + $0x10] sm:$0xff]  ;;  %v478_v26 = vld [vmem:[%s1836_s3 + $0x8] sm:$0xff]  ;;  %v477_v27 = vld [vmem:[%s1836_s3] sm:$0xff]  ;;  %s1784_s10 = scalar_lea.vmem (%p1563_p4), %s1840_s7, %s1032_s23  }
  0x36   : > { %s1623_s12 = scalar_lea.vmem %s1833_s0, %s1009_s30  ;;  %1095 = vmatpush3.msra.mxu0 %v338_v3  ;;  %1124 = vmatpush3.msra.mxu1 %v490_v8  ;;  %v622_v28 = vld [vmem:[#allocation4 + $0x78] sm:$0xff]  ;;  %v621_v29 = vld [vmem:[#allocation4 + $0x70] sm:$0xff]  ;;  %v620_v30 = vld [vmem:[#allocation4 + $0x68] sm:$0xff] }
  0x37   : > { %v330_v7 = vld [vmem:[%s1623_s12] sm:$0xff]  ;;  %1096 = vmatprep.subr.mxu0 %v1496_v0  ;;  %v331_v10 = vld [vmem:[%s1623_s12 + $0x8] sm:$0xff]  ;;  %1125 = vmatprep.subr.mxu1 %v1496_v0  ;;  %v332_v13 = vld [vmem:[%s1623_s12 + $0x10] sm:$0xff] }
  0x38   : > { %1097 = vmatpush3.msra.mxu0 %v337_v5  ;;  %1126 = vmatpush3.msra.mxu1 %v489_v9  ;;  %v333_v16 = vld [vmem:[%s1623_s12 + $0x18] sm:$0xff]  ;;  %v334_v19 = vld [vmem:[%s1623_s12 + $0x20] sm:$0xff]  ;;  %v335_v22 = vld [vmem:[%s1623_s12 + $0x28] sm:$0xff] }
  0x39   : > { %1099 = vmatmul.mubr.msk.f32.vlgmr.msra.gmra.mxu0 %vm348_vm1, %v330_v7  ;;  %1172 = vmatprep.subr.mxu0 %v1496_v0  ;;  %v336_v24 = vld [vmem:[%s1623_s12 + $0x30] sm:$0xff]  ;;  %v619_v31 = vld [vmem:[#allocation4 + $0x60] sm:$0xff]  ;;  %v618_v32 = vld [vmem:[#allocation4 + $0x58] sm:$0xff] }
  0x3a   : > { %1101 = vmatprep.mubr.msk.f32.mxu0 %vm1497_vm0, %v1496_v0  ;;  %1127 = vmatprep.subr.mxu1 %v1496_v0  ;;  %v617_v33 = vld [vmem:[#allocation4 + $0x50] sm:$0xff]  ;;  %v616_v34 = vld [vmem:[#allocation4 + $0x48] sm:$0xff]  ;;  %v615_v35 = vld [vmem:[#allocation4 + $0x40] sm:$0xff] }
  0x3b   : > { %1128 = vmatpush3.msra.mxu1 %v488_v11  ;;  %1173 = vmatpush3.msra.mxu0 %v622_v28  ;;  %v614_v36 = vld [vmem:[#allocation4 + $0x38] sm:$0xff]  ;;  %v613_v37 = vld [vmem:[#allocation4 + $0x30] sm:$0xff]  ;;  %v612_v38 = vld [vmem:[#allocation4 + $0x28] sm:$0xff] }
  0x3c   : > { %1129 = vmatprep.subr.mxu1 %v1496_v0  ;;  %1174 = vmatprep.subr.mxu0 %v1496_v0  ;;  %v611_v39 = vld [vmem:[#allocation4 + $0x20] sm:$0xff]  ;;  %v610_v40 = vld [vmem:[#allocation4 + $0x18] sm:$0xff]  ;;  %v609_v7 = vld [vmem:[#allocation4 + $0x10] sm:$0xff] }
  0x3d   : > { %1102 = vmatmul.mubr.msk.f32.gmra.mxu0 %vm348_vm1, %v331_v10  ;;  %1130 = vmatpush3.msra.mxu1 %v487_v12  ;;  %v1010_v41 = vld [vmem:[%s1835_s2] ss:$0 sm:$0xff]  ;;  %v608_v8 = vld [vmem:[#allocation4 + $0x8] sm:$0xff] }
  0x3e   : > { %1104 = vmatprep.mubr.msk.f32.mxu0 %vm1497_vm0, %v1496_v0  ;;  %1131 = vmatprep.subr.mxu1 %v1496_v0  ;;  %v607_v9 = vld [vmem:[#allocation4] sm:$0xff] }
  0x3f   : > { %1132 = vmatpush3.msra.mxu1 %v486_v14  ;;  %1175 = vmatpush3.msra.mxu0 %v621_v29  ;;  %v1018_v10 = vld [vmem:[%s1837_s4] ss:$0 sm:$0xff] }
  0x40   : > { %1133 = vmatprep.subr.mxu1 %v1496_v0  ;;  %1176 = vmatprep.subr.mxu0 %v1496_v0 }
  0x41   : > { %1105 = vmatmul.mubr.msk.f32.gmra.mxu0 %vm348_vm1, %v332_v13  ;;  %1134 = vmatpush3.msra.mxu1 %v485_v15 }
  0x42   : > { %1107 = vmatprep.mubr.msk.f32.mxu0 %vm1497_vm0, %v1496_v0  ;;  %1135 = vmatprep.subr.mxu1 %v1496_v0 }
  0x43   : > { %1136 = vmatpush3.msra.mxu1 %v484_v17  ;;  %1177 = vmatpush3.msra.mxu0 %v620_v30 }
  0x44   : > { %1137 = vmatprep.subr.mxu1 %v1496_v0  ;;  %1178 = vmatprep.subr.mxu0 %v1496_v0 }
  0x45   : > { %1108 = vmatmul.mubr.msk.f32.gmra.mxu0 %vm348_vm1, %v333_v16  ;;  %1138 = vmatpush3.msra.mxu1 %v483_v18 }
  0x46   : > { %1110 = vmatprep.mubr.msk.f32.mxu0 %vm1497_vm0, %v1496_v0  ;;  %1139 = vmatprep.subr.mxu1 %v1496_v0 }
  0x47   : > { %1140 = vmatpush3.msra.mxu1 %v482_v20  ;;  %1179 = vmatpush3.msra.mxu0 %v619_v31 }
  0x48   : > { %1141 = vmatprep.subr.mxu1 %v1496_v0  ;;  %1180 = vmatprep.subr.mxu0 %v1496_v0 }
  0x49   : > { %1111 = vmatmul.mubr.msk.f32.gmra.mxu0 %vm348_vm1, %v334_v19  ;;  %1142 = vmatpush3.msra.mxu1 %v481_v21 }
  0x4a   : > { %1113 = vmatprep.mubr.msk.f32.mxu0 %vm1497_vm0, %v1496_v0  ;;  %1143 = vmatprep.subr.mxu1 %v1496_v0 }
  0x4b   : > { %1144 = vmatpush3.msra.mxu1 %v480_v23  ;;  %1181 = vmatpush3.msra.mxu0 %v618_v32 }
  0x4c   : > { %1145 = vmatprep.subr.mxu1 %v1496_v0  ;;  %1182 = vmatprep.subr.mxu0 %v1496_v0 }
  0x4d   : > { %1114 = vmatmul.mubr.msk.f32.gmra.mxu0 %vm348_vm1, %v335_v22  ;;  %1146 = vmatpush3.msra.mxu1 %v479_v25 }
  0x4e   : > { %1116 = vmatprep.mubr.msk.f32.mxu0 %vm1497_vm0, %v1496_v0  ;;  %1147 = vmatprep.subr.mxu1 %v1496_v0 }
  0x4f   : > { %1148 = vmatpush3.msra.mxu1 %v478_v26  ;;  %1183 = vmatpush3.msra.mxu0 %v617_v33 }
  0x50   : > { %1149 = vmatprep.subr.mxu1 %v1496_v0  ;;  %1184 = vmatprep.subr.mxu0 %v1496_v0 }
  0x51   : > { %1117 = vmatmul.mubr.msk.f32.gmra.mxu0 %vm348_vm1, %v336_v24  ;;  %1150 = vmatpush3.msra.mxu1 %v477_v27 }
  0x52   : > { %1204 = vmatprep.mubr.msk.f32.mxu0 %vm1497_vm0, %v1496_v0  ;;  %1185 = vmatpush3.msra.mxu0 %v616_v34 }
  0x53   : > { %1186 = vmatprep.subr.mxu0 %v1496_v0 }
  0x54   : > { %1187 = vmatpush3.msra.mxu0 %v615_v35 }
  0x55   : > { %1188 = vmatprep.subr.mxu0 %v1496_v0 }
  0x56   : > { %1189 = vmatpush3.msra.mxu0 %v614_v36 }
  0x57   : > { %1190 = vmatprep.subr.mxu0 %v1496_v0 }
  0x58   : > { %1191 = vmatpush3.msra.mxu0 %v613_v37 }
  0x59   : > { %1192 = vmatprep.subr.mxu0 %v1496_v0 }
  0x5a   : > { %1193 = vmatpush3.msra.mxu0 %v612_v38 }
  0x5b   : > { %1194 = vmatprep.subr.mxu0 %v1496_v0 }
  0x5c   : > { %1195 = vmatpush3.msra.mxu0 %v611_v39  ;;  %v1019_v39 = vld [vmem:[%s1839_s6] ss:$0 sm:$0xff] }
  0x5d   : > { %1196 = vmatprep.subr.mxu0 %v1496_v0 }
  0x5e   : > { %1197 = vmatpush3.msra.mxu0 %v610_v40 }
  0x5f   : > { %1198 = vmatprep.subr.mxu0 %v1496_v0 }
  0x60   : > { %1199 = vmatpush3.msra.mxu0 %v609_v7 }
  0x61   : > { %1200 = vmatprep.subr.mxu0 %v1496_v0 }
  0x62   : > { %1201 = vmatpush3.msra.mxu0 %v608_v8 }
  0x63   : > { %1202 = vmatprep.subr.mxu0 %v1496_v0 }
  0x64   : > { %1203 = vmatpush3.msra.mxu0 %v607_v9 }
  0xf9   : > { %v436_v42 = vpop.f32.mrf.mxu0 }
  0xfa   : > { %v437_v43 = vadd.f32 %v1010_v41, %v436_v42 }
  0xfb   : > { %v1100_v44 = vpop.f32.mrf.mxu0 }
  0xfc   : > { %v470_v45 = vmax.f32 %v437_v43, 0.0 }
  0xfd   : > { %v441_v46 = vpop.f32.mrf.mxu0 }
  0xfe   : > { %v442_v47 = vadd.f32 %v1010_v41, %v441_v46  ;;  %1152 = vmatmul.mubr.f32.vlgmr.msra.gmra.mxu1 %v470_v45 }
  0xff   : > { %v1103_v48 = vpop.f32.mrf.mxu0  ;;  %1154 = vmatprep.mubr.msk.f32.mxu1 %vm1497_vm0, %v1496_v0 }
 0x100   : > { %v471_v49 = vmax.f32 %v442_v47, 0.0 }
 0x101   : > { %v446_v50 = vpop.f32.mrf.mxu0 }
 0x102   : > { %v447_v51 = vadd.f32 %v1010_v41, %v446_v50  ;;  %1155 = vmatmul.mubr.f32.gmra.mxu1 %v471_v49 }
 0x103   : > { %v1106_v52 = vpop.f32.mrf.mxu0  ;;  %1157 = vmatprep.mubr.msk.f32.mxu1 %vm1497_vm0, %v1496_v0 }
 0x104   : > { %v472_v53 = vmax.f32 %v447_v51, 0.0 }
 0x105   : > { %v451_v54 = vpop.f32.mrf.mxu0 }
 0x106   : > { %v452_v55 = vadd.f32 %v1010_v41, %v451_v54  ;;  %1158 = vmatmul.mubr.f32.gmra.mxu1 %v472_v53 }
 0x107   : > { %v1109_v56 = vpop.f32.mrf.mxu0  ;;  %1160 = vmatprep.mubr.msk.f32.mxu1 %vm1497_vm0, %v1496_v0 }
 0x108   : > { %v473_v57 = vmax.f32 %v452_v55, 0.0 }
 0x109   : > { %v456_v58 = vpop.f32.mrf.mxu0 }
 0x10a   : > { %v457_v59 = vadd.f32 %v1010_v41, %v456_v58  ;;  %1161 = vmatmul.mubr.f32.gmra.mxu1 %v473_v57 }
 0x10b   : > { %v1112_v60 = vpop.f32.mrf.mxu0  ;;  %1163 = vmatprep.mubr.msk.f32.mxu1 %vm1497_vm0, %v1496_v0 }
 0x10c   : > { %v474_v61 = vmax.f32 %v457_v59, 0.0 }
 0x10d   : > { %v461_v62 = vpop.f32.mrf.mxu0 }
 0x10e   : > { %v462_v63 = vadd.f32 %v1010_v41, %v461_v62  ;;  %1164 = vmatmul.mubr.f32.gmra.mxu1 %v474_v61 }
 0x10f   : > { %v1115_v1 = vpop.f32.mrf.mxu0  ;;  %1166 = vmatprep.mubr.msk.f32.mxu1 %vm1497_vm0, %v1496_v0 }
 0x110   : > { %v475_v2 = vmax.f32 %v462_v63, 0.0 }
 0x111   : > { %v466_v3 = vpop.f32.mrf.mxu0 }
 0x112   : > { %v467_v4 = vadd.f32 %v1010_v41, %v466_v3  ;;  %1167 = vmatmul.mubr.f32.gmra.mxu1 %v475_v2 }
 0x113   : > { %v1118_v5 = vpop.f32.mrf.mxu0  ;;  %1169 = vmatprep.mubr.msk.f32.mxu1 %vm1497_vm0, %v1496_v0 }
 0x114   : > { %v476_v6 = vmax.f32 %v467_v4, 0.0 }
 0x116   : > { %1170 = vmatmul.mubr.f32.gmra.mxu1 %v476_v6 }
 0x1be   : > { %v566_v11 = vpop.f32.mrf.mxu1 }
 0x1bf   : > { %v567_v12 = vadd.f32 %v1018_v10, %v566_v11 }
 0x1c0   : > { %v1153_v13 = vpop.f32.mrf.mxu1 }
 0x1c1   : > { %v600_v14 = vmax.f32 %v567_v12, 0.0 }
 0x1c2   : > { %v571_v15 = vpop.f32.mrf.mxu1 }
 0x1c3   : > { %v572_v16 = vadd.f32 %v1018_v10, %v571_v15  ;;  %1205 = vmatmul.mubr.f32.vlgmr.msra.gmra.mxu0 %v600_v14 }
 0x1c4   : > { %v1156_v17 = vpop.f32.mrf.mxu1  ;;  %1207 = vmatprep.mubr.msk.f32.mxu0 %vm1497_vm0, %v1496_v0 }
 0x1c5   : > { %v601_v18 = vmax.f32 %v572_v16, 0.0 }
 0x1c6   : > { %v576_v19 = vpop.f32.mrf.mxu1 }
 0x1c7   : > { %v577_v20 = vadd.f32 %v1018_v10, %v576_v19  ;;  %1208 = vmatmul.mubr.f32.gmra.mxu0 %v601_v18 }
 0x1c8   : > { %v1159_v21 = vpop.f32.mrf.mxu1  ;;  %1210 = vmatprep.mubr.msk.f32.mxu0 %vm1497_vm0, %v1496_v0 }
 0x1c9   : > { %v602_v22 = vmax.f32 %v577_v20, 0.0 }
 0x1ca   : > { %v581_v23 = vpop.f32.mrf.mxu1 }
 0x1cb   : > { %v582_v24 = vadd.f32 %v1018_v10, %v581_v23  ;;  %1211 = vmatmul.mubr.f32.gmra.mxu0 %v602_v22 }
 0x1cc   : > { %v1162_v25 = vpop.f32.mrf.mxu1  ;;  %1213 = vmatprep.mubr.msk.f32.mxu0 %vm1497_vm0, %v1496_v0 }
 0x1cd   : > { %v603_v26 = vmax.f32 %v582_v24, 0.0 }
 0x1ce   : > { %v586_v27 = vpop.f32.mrf.mxu1 }
 0x1cf   : > { %v587_v28 = vadd.f32 %v1018_v10, %v586_v27  ;;  %1214 = vmatmul.mubr.f32.gmra.mxu0 %v603_v26 }
 0x1d0   : > { %v1165_v29 = vpop.f32.mrf.mxu1  ;;  %1216 = vmatprep.mubr.msk.f32.mxu0 %vm1497_vm0, %v1496_v0 }
 0x1d1   : > { %v604_v30 = vmax.f32 %v587_v28, 0.0 }
 0x1d2   : > { %v591_v31 = vpop.f32.mrf.mxu1 }
 0x1d3   : > { %v592_v32 = vadd.f32 %v1018_v10, %v591_v31  ;;  %1217 = vmatmul.mubr.f32.gmra.mxu0 %v604_v30 }
 0x1d4   : > { %v1168_v33 = vpop.f32.mrf.mxu1  ;;  %1219 = vmatprep.mubr.msk.f32.mxu0 %vm1497_vm0, %v1496_v0 }
 0x1d5   : > { %v605_v34 = vmax.f32 %v592_v32, 0.0 }
 0x1d6   : > { %v596_v35 = vpop.f32.mrf.mxu1 }
 0x1d7   : > { %v597_v36 = vadd.f32 %v1018_v10, %v596_v35  ;;  %1220 = vmatmul.mubr.f32.gmra.mxu0 %v605_v34 }
 0x1d8   : > { %v1171_v37 = vpop.f32.mrf.mxu1  ;;  %1222 = vmatprep.mubr.msk.f32.mxu0 %vm1497_vm0, %v1496_v0 }
 0x1d9   : > { %v606_v38 = vmax.f32 %v597_v36, 0.0 }
 0x1db   : > { %1223 = vmatmul.mubr.f32.gmra.mxu0 %v606_v38 }
 0x283   : > { %v696_v40 = vpop.f32.mrf.mxu0 }
 0x284   : > { %v697_v41 = vadd.f32 %v1019_v39, %v696_v40 }
 0x285   : > { %v1206_v42 = vpop.f32.mrf.mxu0 }
 0x286   : > { %730 = vst [vmem:[%s1768_s22] sm:$0xff] %v697_v41 }
 0x287   : > { %v701_v0 = vpop.f32.mrf.mxu0 }
 0x288   : > { %v702_v43 = vadd.f32 %v1019_v39, %v701_v0 }
 0x289   : > { %v1209_v44 = vpop.f32.mrf.mxu0 }
 0x28a   : > { %731 = vst [vmem:[%s1768_s22 + $0x8] sm:$0xff] %v702_v43 }
 0x28b   : > { %v706_v45 = vpop.f32.mrf.mxu0 }
 0x28c   : > { %v707_v46 = vadd.f32 %v1019_v39, %v706_v45 }
 0x28d   : > { %v1212_v47 = vpop.f32.mrf.mxu0 }
 0x28e   : > { %732 = vst [vmem:[%s1768_s22 + $0x10] sm:$0xff] %v707_v46 }
 0x28f   : > { %v711_v48 = vpop.f32.mrf.mxu0 }
 0x290   : > { %v712_v49 = vadd.f32 %v1019_v39, %v711_v48 }
 0x291   : > { %v1215_v50 = vpop.f32.mrf.mxu0 }
 0x292   : > { %733 = vst [vmem:[%s1768_s22 + $0x18] sm:$0xff] %v712_v49 }
 0x293   : > { %v716_v51 = vpop.f32.mrf.mxu0 }
 0x294   : > { %v717_v52 = vadd.f32 %v1019_v39, %v716_v51 }
 0x295   : > { %v1218_v53 = vpop.f32.mrf.mxu0 }
 0x296   : > { %734 = vst [vmem:[%s1768_s22 + $0x20] sm:$0xff] %v717_v52 }
 0x297   : > { %v721_v54 = vpop.f32.mrf.mxu0 }
 0x298   : > { %v722_v55 = vadd.f32 %v1019_v39, %v721_v54 }
 0x299   : > { %v1221_v56 = vpop.f32.mrf.mxu0 }
 0x29a   : > { %735 = vst [vmem:[%s1768_s22 + $0x28] sm:$0xff] %v722_v55  ;;  %743 = sbr.rel (!%p1563_p4) target bundleno = 724 (0x2d4), region = 60 }
 0x29b   : > { %v726_v57 = vpop.f32.mrf.mxu0 }
 0x29c   : > { %v727_v58 = vadd.f32 %v1019_v39, %v726_v57 }
 0x29d   : > { %v1224_v59 = vpop.f32.mrf.mxu0 }
 0x29e   : > { %736 = vst [vmem:[%s1768_s22 + $0x30] sm:$0xff] %v727_v58 }
 0x29f   : > { %s1856_s24 = smov (!%p746_p9, %s745_s24), 7 }
 0x2a0   : > { %s1020_s11 = sshll.u32 %s1856_s24, 7 }
 0x2a1   : > { %p1023_p3 = scmp.eq.s32.totalorder %s1020_s11, 0 }
 0x2a2   : > { %1340 = sdivrem.u32 (!%p1023_p3), %s1856_s24, 7 }
 0x2a3   : > { %754 = sbr.rel (%p1023_p3) target bundleno = 724 (0x2d4), region = 64 }
 0x2ab   : > { %s1790_s9 = spop.drf %1340 }
 0x2ac   : > { %p1024_p4 = scmp.le.s32.totalorder %s1790_s9, 0 }
 0x2ad   : > { %s1849_s27 = smov (!%p1024_p4), %s1784_s10  ;;  %s1850_s26 = smov (!%p1024_p4), %s1768_s22 }
 0x2ae   : > { %939 = sbr.rel (%p1024_p4) target bundleno = 699 (0x2bb), region = 141  ;;  %s1799_s12 = smov (!%p1024_p4), 0  }
 0x2af   : > { %s1801_s13 = smov (!%p1024_p4), 0  }
 0x2b3 LB: >> { %v831_v60 = vld [vmem:[%s1466_s26] sm:$0xff]  ;;  %v833_v61 = vld [vmem:[%s1466_s26 + $0x8] sm:$0xff]  ;;  %v835_v62 = vld [vmem:[%s1466_s26 + $0x10] sm:$0xff]  ;;  %s845_s14 = sadd.s32 1, %s1470_s12  ;;  %s825_s13 = sadd.s32 1, %s1474_s13   ;;  %s1474_s13 = sphi %s1801_s13, %s825_s13   ;;  %s1470_s12 = sphi %s1799_s12, %s1851_s12   ;;  %s1466_s26 = sphi %s1850_s26, %s850_s26   ;;  %s1462_s27 = sphi %s1849_s27, %s851_s27  }
 0x2b4   : >> { %832 = vst [vmem:[%s1462_s27] sm:$0xff] %v831_v60  ;;  %834 = vst [vmem:[%s1462_s27 + $0x8] sm:$0xff] %v833_v61  ;;  %v837_v63 = vld [vmem:[%s1466_s26 + $0x18] sm:$0xff]  ;;  %v839_v1 = vld [vmem:[%s1466_s26 + $0x20] sm:$0xff]  ;;  %p846_p5 = scmp.ge.s32.totalorder %s845_s14, %s1790_s9  ;;  %p824_p8 = scmp.ge.s32.totalorder %s825_s13, %s1790_s9 }
 0x2b5   : >> { %836 = vst [vmem:[%s1462_s27 + $0x10] sm:$0xff] %v835_v62  ;;  %v841_v2 = vld [vmem:[%s1466_s26 + $0x28] sm:$0xff]  ;;  %838 = vst [vmem:[%s1462_s27 + $0x18] sm:$0xff] %v837_v63  ;;  %v843_v3 = vld [vmem:[%s1466_s26 + $0x30] sm:$0xff] }
 0x2b6   : >> { %840 = vst [vmem:[%s1462_s27 + $0x20] sm:$0xff] %v839_v1  ;;  %842 = vst [vmem:[%s1462_s27 + $0x28] sm:$0xff] %v841_v2  ;;  %s1858_s14 = smov (%p846_p5, %s845_s14), 0  ;;  %827 = sbr.rel (!%p824_p8) target bundleno = 691 (0x2b3), region = 147 }
 0x2b7   : >> { %844 = vst [vmem:[%s1462_s27 + $0x30] sm:$0xff] %v843_v3  ;;  %s848_s15 = smul.u32 56, %s1858_s14  ;;  %s1851_s12 = smov %s1858_s14 }
 0x2b9   : >> { %s850_s26 = scalar_lea.vmem %s1768_s22, %s848_s15 [#allocation6]   ;;  %s851_s27 = scalar_lea.vmem %s1784_s10, %s848_s15  }
 0x2bb PF: > { %1342 = sdivrem.u32 %s1856_s24, 7 }
 0x2bc   : > { %s1025_s16 = smul.u32 56, %s1790_s9 }
 0x2be   : > { %s856_s17 = scalar_lea.vmem %s1768_s22, %s1025_s16 [#allocation6]   ;;  %s858_s18 = scalar_lea.vmem %s1784_s10, %s1025_s16  }
 0x2c4   : > { %s1343_s19 = spop.drf %1342 }
 0x2c5   : > { %p1027_p11 = scmp.le.s32.totalorder %s1343_s19, 0 }
 0x2c6   : > { %s1476_s20 = smov (!%p1027_p11), %s858_s18   ;;  %s1480_s21 = smov (!%p1027_p11), %s856_s17  }
 0x2c7   : > { %953 = sbr.rel (%p1027_p11) target bundleno = 724 (0x2d4), region = 152  ;;  %s1484_s23 = smov (!%p1027_p11), 0  }
 0x2c8   : > { %s1488_s29 = smov (!%p1027_p11), 0  }
 0x2cc LB: >> { %v868_v4 = vld [vmem:[%s1482_s21] sm:$0xff]  ;;  %s870_s30 = sadd.s32 1, %s1486_s23  ;;  %s862_s29 = sadd.s32 1, %s1490_s29   ;;  %s1490_s29 = sphi %s1488_s29, %s862_s29   ;;  %s1486_s23 = sphi %s1484_s23, %s1485_s23   ;;  %s1482_s21 = sphi %s1480_s21, %s875_s21   ;;  %s1478_s20 = sphi %s1476_s20, %s876_s20  }
 0x2cd   : >> { %869 = vst [vmem:[%s1478_s20] sm:$0xff] %v868_v4  ;;  %p871_p12 = scmp.ge.s32.totalorder %s870_s30, %s1343_s19  ;;  %p861_p0 = scmp.ge.s32.totalorder %s862_s29, %s1343_s19 }
 0x2cf   : >> { %s1860_s30 = smov (%p871_p12, %s870_s30), 0  ;;  %864 = sbr.rel (!%p861_p0) target bundleno = 716 (0x2cc), region = 158 }
 0x2d0   : >> { %s1028_s22 = sshll.u32 %s1860_s30, 3  ;;  %s1485_s23 = smov %s1860_s30  }
 0x2d1   : >> { %s875_s21 = scalar_lea.vmem %s856_s17, %s1028_s22 [#allocation6]   ;;  %s876_s20 = scalar_lea.vmem %s858_s18, %s1028_s22  }
 0x2d4 PF: > { %p16_p13 = scmp.ge.s32.totalorder %s1553_s28, 4   ;;  %s1852_s24 = smov %s1454_s25 }
 0x2d5   : > { %s1853_s25 = smov %s1561_s8  ;;  %s1854_s26 = smov %s1553_s28 }
 0x2d6   :  { %18 = sbr.rel (!%p16_p13) target bundleno = 3 (0x3), region = 169 }
 0x2db   :  { %892 = vsyncpa [#allocation3], 1 }
 0x2dc   :  { %894 = vsyncpa [#allocation3 + $0x1], 1 }
 0x2dd   :  { %895 = vsyncpa [#allocation5], 1 }

</bundles_post_ra>
